<compile_context>
chip_gen: v7x
topology: tpu7x:2x2x1
jax: 0.10.0
libtpu: 0.0.40
codegen_flags: <defaults>
</compile_context>

<pallas_src>
import jax
import jax.numpy as jnp
from jax.experimental import pallas as pl
from jax.experimental.pallas import tpu as pltpu


def _recall_kernel(x_ref, t_ref, tp_ref, tot_ref):
    # x_ref  : (1, C, TS, 128) float32 tile of logits
    # t_ref  : (1, 1, TS, 128) int32 class ids (padded pixels hold C)
    # tp_ref / tot_ref : (1, C, 128) float32, resident across the l grid axis.
    l = pl.program_id(1)

    @pl.when(l == 0)
    def _init():
        tp_ref[...] = jnp.zeros_like(tp_ref)
        tot_ref[...] = jnp.zeros_like(tot_ref)

    x = x_ref[0]            # (C, TS, 128)
    t = t_ref[0, 0]         # (TS, 128)

    # softmax over the channel axis (axis 0) == exp(log_softmax(input, dim=1));
    # with the lane-packed layout these are elementwise VPU ops over C planes
    # plus one EUP exp per element.
    m = jnp.max(x, axis=0)                                    # (TS, 128)
    e = jnp.exp(x - m[None, :, :])                            # (C, TS, 128)
    denom = jnp.sum(e, axis=0)                                # (TS, 128)
    # exact reciprocal keeps tight tolerance; approx=True is a free EUP win if
    # a looser tolerance is acceptable.
    pt = e * pl.reciprocal(denom, approx=False)[None, :, :]   # (C, TS, 128)

    # one-hot(target) without materializing a float one-hot tensor.
    ch = jax.lax.broadcasted_iota(jnp.int32, x.shape, 0)      # channel index
    mask = ch == t[None, :, :]                                # (C, TS, 128) bool

    # Reduce only over the sublane axis; keep lanes dense.  The 128-way lane
    # reduction happens once per (n, c) in the wrapper.
    tp_part = jnp.sum(jnp.where(mask, pt, 0.0), axis=1)       # (C, 128)
    tot_part = jnp.sum(mask.astype(jnp.float32), axis=1)      # (C, 128)

    tp_ref[...] += tp_part[None, :, :]
    tot_ref[...] += tot_part[None, :, :]


def _choose_tile(C, L):
    """Spatial tile TL (multiple of 1024 so TL//128 is a multiple of 8)."""
    target_bytes = 2 * 1024 * 1024                 # ~2 MiB f32 activation tile
    tl = target_bytes // (4 * max(C, 1))
    tl = max(1024, min(32768, (tl // 1024) * 1024))
    l_min = ((L + 1023) // 1024) * 1024            # don't tile wider than L_pad
    return min(tl, l_min)


def _recall_stats(x4, t4, TL):
    """x4: [N, C, S, 128] f32, t4: [N, 1, S, 128] i32 -> (tp [N,C], tot [N,C])."""
    N, C, S, _ = x4.shape
    TS = TL // 128
    num_l = S // TS
    L_pad = S * 128

    cost = pl.CostEstimate(
        flops=int(6 * N * C * L_pad),
        transcendentals=int(N * C * L_pad + N * L_pad),
        bytes_accessed=int(N * C * L_pad * 4 + N * L_pad * 4 + 2 * N * C * 128 * 4),
    )

    tp_p, tot_p = pl.pallas_call(
        _recall_kernel,
        out_shape=(
            jax.ShapeDtypeStruct((N, C, 128), jnp.float32),
            jax.ShapeDtypeStruct((N, C, 128), jnp.float32),
        ),
        grid_spec=pltpu.PrefetchScalarGridSpec(
            num_scalar_prefetch=0,
            grid=(N, num_l),
            in_specs=[
                pl.BlockSpec((1, C, TS, 128), lambda n, l: (n, 0, l, 0)),
                pl.BlockSpec((1, 1, TS, 128), lambda n, l: (n, 0, l, 0)),
            ],
            out_specs=[
                pl.BlockSpec((1, C, 128), lambda n, l: (n, 0, 0)),
                pl.BlockSpec((1, C, 128), lambda n, l: (n, 0, 0)),
            ],
        ),
        compiler_params=pltpu.CompilerParams(
            dimension_semantics=("parallel", "arbitrary"),
        ),
        cost_estimate=cost,
    )(x4, t4)

    # Tiny final lane reduction outside the kernel.
    return jnp.sum(tp_p, axis=-1), jnp.sum(tot_p, axis=-1)   # each (N, C)


def recall_loss(inp, target, weight=None, smooth=1e-5):
    """Forward pass of RecallLoss.

    inp    : float array [N, C, *]  (e.g. [N, C, H, W])
    target : int array   [N, *]     (e.g. [N, H, W]), values in [0, C)
    weight : optional [C,] array (normalized by its sum, as in __init__)
    """
    inp = inp.astype(jnp.float32)
    N, C = inp.shape[:2]
    L = 1
    for d in inp.shape[2:]:
        L *= d

    x = inp.reshape(N, C, L)
    t = target.astype(jnp.int32).reshape(N, L)

    TL = _choose_tile(C, L)
    L_pad = ((L + TL - 1) // TL) * TL
    if L_pad != L:
        pad = L_pad - L
        # padded pixels: finite zeros for x, out-of-range class C for target
        # -> one-hot mask is all-zero, contributing nothing to tp or tot.
        x = jnp.pad(x, ((0, 0), (0, 0), (0, pad)))
        t = jnp.pad(t, ((0, 0), (0, pad)), constant_values=C)

    x4 = x.reshape(N, C, L_pad // 128, 128)
    t4 = t.reshape(N, 1, L_pad // 128, 128)

    tp, tot = _recall_stats(x4, t4, TL)

    recall = (tp + smooth) / (tot + smooth)          # [N, C]
    if weight is not None:
        w = weight.astype(jnp.float32)
        w = w / jnp.sum(w)                           # self.weight = weight / sum(weight)
        recall = (jnp.ones((N, C), jnp.float32) - recall) * w[None, :] * C
    # Matches the module: without weight, the loss is mean(recall) (no 1 - recall).
    return jnp.mean(recall)


if __name__ == "__main__":
    key = jax.random.PRNGKey(0)
    k1, k2 = jax.random.split(key)

    N, C, H, W = 2, 4, 16, 16
    x = jax.random.normal(k1, (N, C, H, W), dtype=jnp.float32)
    target = jax.random.randint(k2, (N, H, W), 0, C, dtype=jnp.int32)

    # Deterministic class weights (shape [C,]); module normalizes them by sum.
    weight = jnp.arange(1, C + 1, dtype=jnp.float32)

    loss = recall_loss(x, target, weight=weight)
    loss = jax.block_until_ready(loss)

    # pure-JAX reference check of the same math (unpadded)
    logpt = jax.nn.log_softmax(x.reshape(N, C, -1), axis=1)
    pt = jnp.exp(logpt)
    onehot = jax.nn.one_hot(target.reshape(N, -1), C, axis=1, dtype=jnp.float32)
    tp_ref = jnp.sum(pt * onehot, axis=2)
    tot_ref = jnp.sum(onehot, axis=2)
    rec_ref = (tp_ref + 1e-5) / (tot_ref + 1e-5)
    w = weight / jnp.sum(weight)
    ref = jnp.mean((1.0 - rec_ref) * w[None, :] * C)
    assert jnp.allclose(loss, ref, rtol=1e-5, atol=1e-5), (loss, ref)

    # also exercise the weight=None branch (mean(recall), per the module spec)
    loss_nw = jax.block_until_ready(recall_loss(x, target, weight=None))
    ref_nw = jnp.mean(rec_ref)
    assert jnp.allclose(loss_nw, ref_nw, rtol=1e-5, atol=1e-5), (loss_nw, ref_nw)

    print("KERNEL_OK")
</pallas_src>

<mosaic_0001>
module attributes {stable_mosaic.version = 11 : i64} {
  func.func @_recall_kernel(%arg0: i32, %arg1: i32, %arg2: memref<1x4x8x128xf32, #tpu.memory_space<vmem>>, %arg3: memref<1x1x8x128xi32, #tpu.memory_space<vmem>>, %arg4: memref<1x4x128xf32, #tpu.memory_space<vmem>>, %arg5: memref<1x4x128xf32, #tpu.memory_space<vmem>>) attributes {dimension_semantics = [#tpu.dimension_semantics<parallel>, #tpu.dimension_semantics<arbitrary>], iteration_bounds = array<i64: 2, 1>, scalar_prefetch = 0 : i64, scratch_operands = 0 : i64, tpu.core_type = #tpu.core_type<tc>, window_params = [{transform_indices = @transform_0, window_bounds = array<i64: 1, 4, 8, 128>}, {transform_indices = @transform_1, window_bounds = array<i64: 1, 1, 8, 128>}, {transform_indices = @transform_2, window_bounds = array<i64: 1, 4, 128>}, {transform_indices = @transform_3, window_bounds = array<i64: 1, 4, 128>}]} {
    %c0_i32 = arith.constant 0 : i32
    %0 = arith.cmpi eq, %arg1, %c0_i32 : i32
    %1 = arith.extui %0 : i1 to i32
    %c0_i32_0 = arith.constant 0 : i32
    %2 = arith.cmpi ne, %1, %c0_i32_0 : i32
    scf.if %2 {
      %cst_24 = arith.constant 0.000000e+00 : f32
      %35 = vector.broadcast %cst_24 : f32 to vector<1x4x128xf32>
      %c0_25 = arith.constant 0 : index
      %c0_26 = arith.constant 0 : index
      %c0_27 = arith.constant 0 : index
      %36 = vector.load %arg4[%c0_25, %c0_26, %c0_27] : memref<1x4x128xf32, #tpu.memory_space<vmem>>, vector<1x4x128xf32>
      tpu.vector_store %arg4[%c0_25, %c0_26, %c0_27], %35 {strides = array<i32>} : memref<1x4x128xf32, #tpu.memory_space<vmem>>, vector<1x4x128xf32>,
      %cst_28 = arith.constant 0.000000e+00 : f32
      %37 = vector.broadcast %cst_28 : f32 to vector<1x4x128xf32>
      %c0_29 = arith.constant 0 : index
      %c0_30 = arith.constant 0 : index
      %c0_31 = arith.constant 0 : index
      %38 = vector.load %arg5[%c0_29, %c0_30, %c0_31] : memref<1x4x128xf32, #tpu.memory_space<vmem>>, vector<1x4x128xf32>
      tpu.vector_store %arg5[%c0_29, %c0_30, %c0_31], %37 {strides = array<i32>} : memref<1x4x128xf32, #tpu.memory_space<vmem>>, vector<1x4x128xf32>,
    } else {
    }
    %c0 = arith.constant 0 : index
    %c0_1 = arith.constant 0 : index
    %c0_2 = arith.constant 0 : index
    %c0_3 = arith.constant 0 : index
    %3 = vector.load %arg2[%c0, %c0_1, %c0_2, %c0_3] : memref<1x4x8x128xf32, #tpu.memory_space<vmem>>, vector<1x4x8x128xf32>
    %4 = vector.shape_cast %3 : vector<1x4x8x128xf32> to vector<4x8x128xf32>
    %c0_4 = arith.constant 0 : index
    %c0_5 = arith.constant 0 : index
    %c0_6 = arith.constant 0 : index
    %c0_7 = arith.constant 0 : index
    %5 = vector.load %arg3[%c0_4, %c0_5, %c0_6, %c0_7] : memref<1x1x8x128xi32, #tpu.memory_space<vmem>>, vector<1x1x8x128xi32>
    %6 = vector.shape_cast %5 : vector<1x1x8x128xi32> to vector<8x128xi32>
    %cst = arith.constant dense<0xFF800000> : vector<8x128xf32>
    %7 = vector.multi_reduction <maximumf>, %4, %cst [0] : vector<4x8x128xf32> to vector<8x128xf32>
    %8 = vector.shape_cast %7 : vector<8x128xf32> to vector<1x8x128xf32>
    %9 = vector.broadcast %8 : vector<1x8x128xf32> to vector<4x8x128xf32>
    %10 = arith.subf %4, %9 : vector<4x8x128xf32>
    %11 = math.exp %10 : vector<4x8x128xf32>
    %cst_8 = arith.constant dense<0.000000e+00> : vector<8x128xf32>
    %12 = vector.multi_reduction <add>, %11, %cst_8 [0] : vector<4x8x128xf32> to vector<8x128xf32>
    %13 = tpu.reciprocal %12 : vector<8x128xf32> -> vector<8x128xf32>
    %14 = vector.shape_cast %13 : vector<8x128xf32> to vector<1x8x128xf32>
    %15 = vector.broadcast %14 : vector<1x8x128xf32> to vector<4x8x128xf32>
    %16 = arith.mulf %11, %15 : vector<4x8x128xf32>
    %17 = tpu.iota {dimensions = array<i32: 0>} : vector<4x8x128xi32>
    %18 = vector.shape_cast %6 : vector<8x128xi32> to vector<1x8x128xi32>
    %19 = vector.broadcast %18 : vector<1x8x128xi32> to vector<4x8x128xi32>
    %20 = arith.cmpi eq, %17, %19 : vector<4x8x128xi32>
    %cst_9 = arith.constant 0.000000e+00 : f32
    %21 = vector.broadcast %cst_9 : f32 to vector<4x8x128xf32>
    %22 = arith.select %20, %16, %21 : vector<4x8x128xi1>, vector<4x8x128xf32>
    %cst_10 = arith.constant dense<0.000000e+00> : vector<4x128xf32>
    %23 = vector.multi_reduction <add>, %22, %cst_10 [1] : vector<4x8x128xf32> to vector<4x128xf32>
    %24 = arith.extui %20 : vector<4x8x128xi1> to vector<4x8x128xi32>
    %25 = arith.sitofp %24 : vector<4x8x128xi32> to vector<4x8x128xf32>
    %cst_11 = arith.constant dense<0.000000e+00> : vector<4x128xf32>
    %26 = vector.multi_reduction <add>, %25, %cst_11 [1] : vector<4x8x128xf32> to vector<4x128xf32>
    %c0_12 = arith.constant 0 : index
    %c0_13 = arith.constant 0 : index
    %c0_14 = arith.constant 0 : index
    %27 = vector.load %arg4[%c0_12, %c0_13, %c0_14] : memref<1x4x128xf32, #tpu.memory_space<vmem>>, vector<1x4x128xf32>
    %28 = vector.shape_cast %23 : vector<4x128xf32> to vector<1x4x128xf32>
    %29 = arith.addf %27, %28 : vector<1x4x128xf32>
    %c0_15 = arith.constant 0 : index
    %c0_16 = arith.constant 0 : index
    %c0_17 = arith.constant 0 : index
    %30 = vector.load %arg4[%c0_15, %c0_16, %c0_17] : memref<1x4x128xf32, #tpu.memory_space<vmem>>, vector<1x4x128xf32>
    tpu.vector_store %arg4[%c0_15, %c0_16, %c0_17], %29 {strides = array<i32>} : memref<1x4x128xf32, #tpu.memory_space<vmem>>, vector<1x4x128xf32>,
    %c0_18 = arith.constant 0 : index
    %c0_19 = arith.constant 0 : index
    %c0_20 = arith.constant 0 : index
    %31 = vector.load %arg5[%c0_18, %c0_19, %c0_20] : memref<1x4x128xf32, #tpu.memory_space<vmem>>, vector<1x4x128xf32>
    %32 = vector.shape_cast %26 : vector<4x128xf32> to vector<1x4x128xf32>
    %33 = arith.addf %31, %32 : vector<1x4x128xf32>
    %c0_21 = arith.constant 0 : index
    %c0_22 = arith.constant 0 : index
    %c0_23 = arith.constant 0 : index
    %34 = vector.load %arg5[%c0_21, %c0_22, %c0_23] : memref<1x4x128xf32, #tpu.memory_space<vmem>>, vector<1x4x128xf32>
    tpu.vector_store %arg5[%c0_21, %c0_22, %c0_23], %33 {strides = array<i32>} : memref<1x4x128xf32, #tpu.memory_space<vmem>>, vector<1x4x128xf32>,
    return
  }
  func.func @transform_0(%arg0: i32, %arg1: i32) -> (i32, i32, i32, i32) {
    %c0_i32 = arith.constant 0 : i32
    %c0_i32_0 = arith.constant 0 : i32
    %c0_i32_1 = arith.constant 0 : i32
    return %arg0, %c0_i32, %arg1, %c0_i32_0 : i32, i32, i32, i32
  }
  func.func @transform_1(%arg0: i32, %arg1: i32) -> (i32, i32, i32, i32) {
    %c0_i32 = arith.constant 0 : i32
    %c0_i32_0 = arith.constant 0 : i32
    %c0_i32_1 = arith.constant 0 : i32
    return %arg0, %c0_i32, %arg1, %c0_i32_0 : i32, i32, i32, i32
  }
  func.func @transform_2(%arg0: i32, %arg1: i32) -> (i32, i32, i32) {
    %c0_i32 = arith.constant 0 : i32
    %c0_i32_0 = arith.constant 0 : i32
    %c0_i32_1 = arith.constant 0 : i32
    return %arg0, %c0_i32, %c0_i32_0 : i32, i32, i32
  }
  func.func @transform_3(%arg0: i32, %arg1: i32) -> (i32, i32, i32) {
    %c0_i32 = arith.constant 0 : i32
    %c0_i32_0 = arith.constant 0 : i32
    %c0_i32_1 = arith.constant 0 : i32
    return %arg0, %c0_i32, %c0_i32_0 : i32, i32, i32
  }
}

</mosaic_0001>

<bundles_post_ra>
// kernel: tpu_custom_call.1
= control target key start
LH: loop header
LB: loop body
LE: loop exit
PB: predicated region body
PF: predicated region fallthrough
CT: control target
= control target key end

     0   :  { %9 = vsyncpa [#allocation3], 0  ;;  %s1152_s0 = inlined_call_operand.hbm [shape: f32[2,4,8,128], index: 0, kind: input, shape index: {}]   ;;  %s1153_s1 = inlined_call_operand.hbm [shape: s32[2,1,8,128], index: 1, kind: input, shape index: {}]   ;;  %s1154_s2 = inlined_call_operand.hbm [shape: f32[2,4,128], index: 2, kind: output, shape index: {0}]   ;;  %s1155_s3 = inlined_call_operand.hbm [shape: f32[2,4,128], index: 3, kind: output, shape index: {1}]  }
   0x1   :  { %11 = vsyncpa [#allocation3 + $0x1], 0 }
   0x2   :  { %12 = vsyncpa [#allocation6], 0 }
   0x3   :  { %14 = vsyncpa [#allocation6 + $0x1], 0 }
   0x4   :  { %15 = vsyncpa [#allocation4], 0 }
   0x5   :  { %17 = vsyncpa [#allocation4 + $0x1], 0 }
   0x6   :  { %18 = vsyncpa [#allocation9], 0 }
   0x7   :  { %20 = vsyncpa [#allocation9 + $0x1], 0  ;;  %s863_s12 = smov 0   ;;  %s865_s13 = smov 0  }
   0x8   :  { %s867_s14 = smov 0   ;;  %s869_s15 = smov 0  }
   0x9   :  { %s871_s16 = smov 0   ;;  %s873_s17 = smov 0  }
   0xa LB: > { %s546_s18 = sadd.s32 4294967295, %s834_s17   ;;  %s547_s19 = sadd.s32 4294967294, %s834_s17   ;;  %s834_s17 = sphi %s873_s17, %s26_s17   ;;  %s830_s16 = sphi %s871_s16, %s1174_s16   ;;  %s826_s15 = sphi %s869_s15, %s1173_s15   ;;  %s822_s14 = sphi %s867_s14, %s1172_s14   ;;  %s818_s13 = sphi %s865_s13, %s1171_s13   ;;  %s814_s12 = sphi %s863_s12, %s1170_s12  }
   0xb   : > { %s38_s20 = sadd.s32 1, %s830_s16  ;;  %s47_s21 = sadd.s32 1, %s822_s14 }
   0xc   : > { %p40_p0 = scmp.ge.s32.totalorder %s38_s20, 2  ;;  %p54_p1 = scmp.ne.s32.totalorder %s822_s14, %s818_s13 }
   0xd   : > { %p55_p2 = scmp.eq.s32.totalorder %s834_s17, 0  ;;  %p60_p3 = scmp.ne.s32.totalorder %s818_s13, %s814_s12 }
   0xe   : > { %s1176_s20 = smov (%p40_p0, %s38_s20), 0  ;;  %p61_p5 = scmp.eq.s32.totalorder %s546_s18, 0 }
   0xf   : > { %p904_p4 = por %p55_p2, %p54_p1  ;;  %s42_s23 = ssub.s32 %s830_s16, %s1176_s20 }
  0x10   : > { %p112_p6 = scmp.eq.s32.totalorder %s546_s18, 1  ;;  %p45_p7 = scmp.eq.s32.totalorder %s42_s23, 0 }
  0x11   : > { %p910_p8 = por %p61_p5, %p60_p3  ;;  %p118_p10 = scmp.eq.s32.totalorder %s547_s19, 1 }
  0x12   : > { %p914_p9 = por %p112_p6, %p54_p1  ;;  %p593_p13 = scmp.lt.s32.totalorder %s834_s17, 2 }
  0x13   : > { %s1159_s24 = scalar_select %p910_p8, 1, 0 }
  0x14   : > { %s1160_s25 = scalar_select %p914_p9, 1, 0 }
  0x15   : > { %s919_s26 = scalar_select %p45_p7, %s822_s14, %s47_s21  }
  0x16   : > { %p921_p11 = por %p118_p10, %p60_p3  ;;  %s928_s28 = sand.u32 1, %s822_s14  }
  0x17   : > { %s550_s29 = sshll.u32 %s928_s28, 5  ;;  %s570_s30 = sshll.u32 %s830_s16, 9 }
  0x18   : > { %s1161_s27 = scalar_select %p921_p11, 1, 0 }
  0x19   : > { %s935_s6 = scalar_lea.hbm %s1152_s0, %s570_s30  ;;  %s168_s7 = scalar_lea.vmem [#allocation2], %s550_s29 }
  0x1a   : > { %s176_s8 = sshll.u32 %s168_s7, 4  ;;  %p941_p0 = pnand %p593_p13, %p904_p4  ;;  %s937_s8 = int_to_ptr.vmem [resolvable:$true] %s176_s8 }
  0x1b   : > { %s165_s10 = scalar_lea.sflag [#allocation3], %s928_s28  ;;  %s656_s11 = scalar_lea.hbm %s935_s6, 512 }
  0x1c   : > { %p657_p2 = scmp.ne.s32.totalorder %s935_s6, %s656_s11  ;;  %p658_p3 = pneg %p941_p0 }
  0x1d   : > { %s661_s21 = scalar_lea.hbm %s1152_s0, 1024  ;;  %p662_p4 = scmp.lt.u32.totalorder %s935_s6, %s1152_s0 }
  0x1e   : > { %p659_p5 = pnand %p658_p3, %p657_p2  ;;  %p663_p7 = scmp.lt.u32.totalorder %s661_s21, %s656_s11 }
  0x1f   : > { %p665_p13 = scmp.lt.u32.totalorder %s656_s11, %s935_s6 }
  0x20   : > { %p660_p6 = pneg %p659_p5  ;;  %p664_p10 = por %p663_p7, %p662_p4 }
  0x22   : > { %p666_p12 = por %p665_p13, %p664_p10 }
  0x24   : > { %p667_p1 = pnand %p666_p12, %p660_p6 }
  0x26   : > { %670 = shalt.err (!%p667_p1)
}
  0x27   : > { %s671_s29 = scalar_lea.vmem %s937_s8, 512  ;;  %s836_s30 = smov [#allocation2]  }
  0x28   : > { %p672_p2 = scmp.ne.s32.totalorder %s937_s8, %s671_s29  ;;  %s676_s4 = sshll.u32 %s836_s30, 4  ;;  %s677_s4 = int_to_ptr.vmem [resolvable:$false] %s676_s4 }
  0x29   : > { %s678_s5 = scalar_lea.vmem %s677_s4, 1024  ;;  %p679_p9 = scmp.lt.s32.totalorder %s937_s8, %s677_s4 }
  0x2a   : > { %p674_p5 = pnand %p672_p2, %p658_p3  ;;  %p680_p4 = scmp.lt.s32.totalorder %s678_s5, %s671_s29 }
  0x2c   : > { %p675_p11 = pneg %p674_p5  ;;  %p681_p7 = por %p680_p4, %p679_p9 }
  0x2e   : > { %p682_p10 = pnand %p681_p7, %p675_p11 }
  0x30   : > { %685 = shalt.err (!%p682_p10)
}
  0x31   : > { %s837_s7 = smov 128   ;;  %s838_s11 = smov 8  }
  0x32   : > { %582 = dma.hbm_to_vmem [thread:$0]  (!%p941_p0), %s935_s6, 512, %s937_s8, %s165_s10, %s837_s7, %s837_s7, %s838_s11  }
  0x33   : > { %p203_p12 = scmp.lt.s32.totalorder %s834_s17, 3  ;;  %s553_s18 = sshll.u32 %s928_s28, 3 }
  0x34   : > { %s554_s19 = sshll.u32 %s830_s16, 7  ;;  %p1163_p9 = scmp.ge.s32.totalorder %s834_s17, 1 }
  0x35   : > { %s986_s29 = scalar_lea.hbm %s1153_s1, %s554_s19  ;;  %s190_s30 = scalar_lea.vmem [#allocation5], %s553_s18 }
  0x36   : > { %p979_p11 = pnand %p1163_p9, %p203_p12  ;;  %s198_s4 = sshll.u32 %s190_s30, 4  ;;  %s199_s4 = int_to_ptr.vmem [resolvable:$true] %s198_s4 }
  0x37   : > { %s187_s6 = scalar_lea.sflag [#allocation6], %s928_s28  ;;  %s686_s8 = scalar_lea.hbm %s986_s29, 128 }
  0x38   : > { %s1164_s21 = scalar_select %p979_p11, 1, 0 }
  0x39   : > { %p687_p1 = scmp.ne.s32.totalorder %s986_s29, %s686_s8  ;;  %s691_s7 = scalar_lea.hbm %s1153_s1, 256 }
  0x3a   : > { %p692_p2 = scmp.lt.u32.totalorder %s986_s29, %s1153_s1  ;;  %p693_p5 = scmp.lt.u32.totalorder %s691_s7, %s686_s8 }
  0x3b   : > { %p689_p6 = pnand %p687_p1, %p658_p3  ;;  %p695_p7 = scmp.lt.u32.totalorder %s686_s8, %s986_s29 }
  0x3c   : > { %p694_p4 = por %p693_p5, %p692_p2 }
  0x3d   : > { %p690_p13 = pneg %p689_p6 }
  0x3e   : > { %p696_p10 = por %p695_p7, %p694_p4 }
  0x40   : > { %p697_p12 = pnand %p696_p10, %p690_p13 }
  0x42   : > { %700 = shalt.err (!%p697_p12)
}
  0x43   : > { %s701_s28 = scalar_lea.vmem %s199_s4, 128  ;;  %s839_s18 = smov [#allocation5]  }
  0x44   : > { %p702_p9 = scmp.ne.s32.totalorder %s199_s4, %s701_s28  ;;  %s706_s22 = sshll.u32 %s839_s18, 4  ;;  %s707_s22 = int_to_ptr.vmem [resolvable:$false] %s706_s22 }
  0x45   : > { %s708_s23 = scalar_lea.vmem %s707_s22, 256  ;;  %p709_p8 = scmp.lt.s32.totalorder %s199_s4, %s707_s22 }
  0x46   : > { %p704_p1 = pnand %p702_p9, %p658_p3  ;;  %p710_p11 = scmp.lt.s32.totalorder %s708_s23, %s701_s28 }
  0x48   : > { %p705_p6 = pneg %p704_p1  ;;  %p711_p2 = por %p710_p11, %p709_p8 }
  0x4a   : > { %p712_p5 = pnand %p711_p2, %p705_p6 }
  0x4c   : > { %715 = shalt.err (!%p712_p5)
}
  0x4d   : > { %585 = dma.hbm_to_vmem [thread:$0]  (!%p941_p0), %s986_s29, 128, %s199_s4, %s187_s6  }
  0x4e   : > { %p1165_p13 = scmp.ne.s32.totalorder %s1164_s21, 0 }
  0x4f   : > { %s1011_s30 = sand.u32 (!%p1165_p13), 1, %s818_s13   ;;  %p1166_p3 = scmp.ne.s32.totalorder (!%p1165_p13), %s1159_s24, 0 }
  0x50   : > { %207 = sbr.rel (%p1165_p13) target bundleno = 175 (0xaf), region = 28  ;;  %s556_s8 = sshll.u32 (!%p1165_p13), %s1011_s30, 5 }
  0x51   : > { %s210_s10 = scalar_lea.sflag (!%p1165_p13), [#allocation3], %s1011_s30  ;;  %s213_s5 = scalar_lea.vmem (!%p1165_p13), [#allocation2], %s556_s8 }
  0x57   : > { %797 = dma.done.wait (%p1166_p3), %s210_s10, 512  }
  0x58   : > { %799 = vsyncadd (%p1166_p3), %s210_s10, 4294966784  ;;  %s557_s9 = sshll.u32 %s1011_s30, 3  ;;  %s219_s21 = scalar_lea.sflag [#allocation6], %s1011_s30 }
  0x59   : > { %s222_s29 = scalar_lea.vmem [#allocation5], %s557_s9 }
  0x5a   : > { %801 = dma.done.wait (%p1166_p3), %s219_s21, 128  }
  0x5b   : > { %803 = vsyncadd (%p1166_p3), %s219_s21, 4294967168  ;;  %s558_s4 = sshll.u32 %s1011_s30, 2  ;;  %v840_v0 = vmov 0.0   ;;  %v261_v1 = vld [vmem:[%s213_s5] sm:$0xff]  ;;  %v262_v2 = vld [vmem:[%s213_s5 + $0x8] sm:$0xff]  ;;  %vm358_vm4 = vcmask 1041409  }
  0x5c   : > { %s1026_s6 = scalar_lea.vmem [#allocation7], %s558_s4  ;;  %s1029_s7 = scalar_lea.vmem [#allocation8], %s558_s4  ;;  %v263_v3 = vld [vmem:[%s213_s5 + $0x10] sm:$0xff]  ;;  %v264_v4 = vld [vmem:[%s213_s5 + $0x18] sm:$0xff]  ;;  %v1032_v5 = vld [vmem:[%s222_s29] sm:$0xff]  ;;  %v266_v6 = vmax.f32 %v261_v1, %v262_v2  ;;  %vm360_vm5 = vcmask 1042434  }
  0x5d   : > { %259 = vst [vmem:[%s1026_s6] sm:$0xf] %v840_v0  ;;  %260 = vst [vmem:[%s1029_s7] sm:$0xf] %v840_v0  ;;  %v267_v7 = vmax.f32 %v263_v3, %v264_v4  ;;  %vm289_vm0 = vcmp.eq.s32.totalorder %v1032_v5, 0  ;;  %vm290_vm1 = vcmp.eq.s32.totalorder %v1032_v5, 1  ;;  %vm291_vm2 = vcmp.eq.s32.totalorder %v1032_v5, 2  ;;  %s566_s24 = sshll.u32 %s826_s15, 6 }
  0x5e   : > { %v560_v8 = vsel %vm289_vm0, 1.0, %v840_v0  ;;  %v561_v9 = vsel %vm290_vm1, 1.0, %v840_v0  ;;  %v562_v10 = vsel %vm291_vm2, 1.0, %v840_v0  ;;  %vm292_vm3 = vcmp.eq.s32.totalorder %v1032_v5, 3  ;;  %s410_s11 = sshll.u32 %s1029_s7, 4  ;;  %s1057_s18 = scalar_lea.hbm %s1155_s3, %s566_s24  ;;  %s1059_s11 = int_to_ptr.vmem [resolvable:$true] %s410_s11 }
  0x5f   : > { %v268_v11 = vmax.f32 %v266_v6, %v267_v7  ;;  %v329_v12 = vrot.slane %v560_v8, 4  ;;  %v335_v13 = vrot.slane %v561_v9, 4  ;;  %v341_v14 = vrot.slane %v562_v10, 4  ;;  %s384_s22 = scalar_lea.sflag [#allocation9], %s1011_s30  ;;  %s716_s23 = scalar_lea.vmem %s1059_s11, 64 }
  0x60   : > { %v563_v15 = vsel %vm292_vm3, 1.0, %v840_v0  ;;  %vm362_vm6 = vcmask 1043459   ;;  %p717_p8 = scmp.ne.s32.totalorder %s1059_s11, %s716_s23  ;;  %p1167_p0 = scmp.ne.s32.totalorder %s1160_s25, 0 }
  0x61   : > { %v269_v16 = vsub.f32 %v261_v1, %v268_v11  ;;  %v270_v17 = vsub.f32 %v262_v2, %v268_v11  ;;  %v271_v18 = vsub.f32 %v263_v3, %v268_v11  ;;  %v272_v19 = vsub.f32 %v264_v4, %v268_v11  ;;  %s841_s8 = smov [#allocation8]  }
  0x62   : > { %v330_v20 = vadd.f32 %v560_v8, %v329_v12  ;;  %v336_v21 = vadd.f32 %v561_v9, %v335_v13  ;;  %v342_v22 = vadd.f32 %v562_v10, %v341_v14  ;;  %v347_v23 = vrot.slane %v563_v15, 4  ;;  %p718_p11 = pnand %p717_p8, %p1167_p0  ;;  %s720_s10 = sshll.u32 %s841_s8, 4  ;;  %s721_s10 = int_to_ptr.vmem [resolvable:$false] %s720_s10 }
  0x63   : > { %v273_v24 = vmul.f32 1.442695, %v269_v16  ;;  %v275_v25 = vmul.f32 1.442695, %v270_v17  ;;  %v277_v26 = vmul.f32 1.442695, %v271_v18  ;;  %p723_p7 = scmp.lt.s32.totalorder %s1059_s11, %s721_s10 }
  0x64   : > { %v279_v27 = vmul.f32 1.442695, %v272_v19  ;;  %v331_v28 = vrot.slane %v330_v20, 2  ;;  %v337_v29 = vrot.slane %v336_v21, 2  ;;  %v343_v30 = vrot.slane %v342_v22, 2  ;;  %p719_p4 = pneg %p718_p11  ;;  %s722_s5 = scalar_lea.vmem %s721_s10, 128 }
  0x65   : > { %646 = vpow2.f32 %v273_v24  ;;  %v348_v31 = vadd.f32 %v563_v15, %v347_v23  ;;  %v367_v46 = vld [vmem:[%s1029_s7] sm:$0xf]  ;;  %p724_p10 = scmp.lt.s32.totalorder %s722_s5, %s716_s23 }
  0x66   : > { %648 = vpow2.f32 %v275_v25  ;;  %v332_v32 = vadd.f32 %v331_v28, %v330_v20  ;;  %v338_v33 = vadd.f32 %v337_v29, %v336_v21  ;;  %v344_v34 = vadd.f32 %v343_v30, %v342_v22 }
  0x67   : > { %650 = vpow2.f32 %v277_v26  ;;  %v349_v35 = vrot.slane %v348_v31, 2  ;;  %p725_p12 = por %p724_p10, %p723_p7 }
  0x68   : > { %652 = vpow2.f32 %v279_v27  ;;  %v333_v36 = vrot.slane %v332_v32, 1  ;;  %v339_v37 = vrot.slane %v338_v33, 1  ;;  %v345_v38 = vrot.slane %v344_v34, 1 }
  0x69   : > { %v350_v39 = vadd.f32 %v349_v35, %v348_v31  ;;  %p726_p9 = pnand %p725_p12, %p719_p4 }
  0x6a   : > { %v334_v40 = vadd.f32 %v333_v36, %v332_v32  ;;  %v340_v41 = vadd.f32 %v339_v37, %v338_v33  ;;  %v346_v42 = vadd.f32 %v345_v38, %v344_v34 }
  0x6b   : > { %v351_v43 = vrot.slane %v350_v39, 1 }
  0x6c   : > { %v372_v44 = vsel %vm358_vm4, %v340_v41, %v334_v40 }
  0x6d   : > { %v352_v45 = vadd.f32 %v351_v43, %v350_v39  ;;  %v373_v47 = vsel %vm360_vm5, %v346_v42, %v372_v44 }
  0x6f   : > { %v647_v48 = vpop.eup %646  ;;  %v374_v49 = vsel %vm362_vm6, %v352_v45, %v373_v47 }
  0x70   : > { %v649_v50 = vpop.eup %648  ;;  %v376_v51 = vadd.f32 %v374_v49, %v367_v46 }
  0x71   : > { %v651_v52 = vpop.eup %650  ;;  %v281_v53 = vadd.f32 %v649_v50, %v647_v48 }
  0x72   : > { %v653_v54 = vpop.eup %652  ;;  %377 = vst [vmem:[%s1029_s7] sm:$0xf] %v376_v51 }
  0x73   : > { %v282_v55 = vadd.f32 %v651_v52, %v281_v53 }
  0x74   : > { %729 = shalt.err (!%p726_p9)
}
  0x75   : > { %s730_s9 = scalar_lea.hbm %s1057_s18, 64  ;;  %s734_s4 = scalar_lea.hbm %s1155_s3, 128 }
  0x76   : > { %p731_p1 = scmp.ne.s32.totalorder %s1057_s18, %s730_s9  ;;  %p735_p5 = scmp.lt.u32.totalorder %s1057_s18, %s1155_s3 }
  0x77   : > { %p736_p13 = scmp.lt.u32.totalorder %s734_s4, %s730_s9  ;;  %p738_p8 = scmp.lt.u32.totalorder %s730_s9, %s1057_s18 }
  0x78   : > { %p732_p6 = pnand %p731_p1, %p1167_p0 }
  0x79   : > { %p737_p3 = por %p736_p13, %p735_p5 }
  0x7a   : > { %p733_p2 = pneg %p732_p6 }
  0x7b   : > { %p739_p11 = por %p738_p8, %p737_p3 }
  0x7d   : > { %p740_p4 = pnand %p739_p11, %p733_p2 }
  0x7f   : > { %743 = shalt.err (!%p740_p4)
}
  0x80   : > { %576 = dma.vmem_to_hbm [thread:$0]  (%p1167_p0), %s1059_s11, 64, %s1057_s18, %s384_s22   ;;  %v283_v56 = vadd.f32 %v653_v54, %v282_v55  ;;  %v353_v26 = vld [vmem:[%s1026_s6] sm:$0xf] }
  0x81   : > { %s397_s11 = sshll.u32 %s1026_s6, 4  ;;  %s1102_s22 = scalar_lea.hbm %s1154_s2, %s566_s24  ;;  %s1104_s11 = int_to_ptr.vmem [resolvable:$true] %s397_s11 }
  0x82   : > { %654 = vrcp.f32 %v283_v56  ;;  %s379_s23 = scalar_lea.sflag [#allocation4], %s1011_s30  ;;  %s744_s8 = scalar_lea.vmem %s1104_s11, 64 }
  0x83   : > { %p745_p7 = scmp.ne.s32.totalorder %s1104_s11, %s744_s8  ;;  %s842_s10 = smov [#allocation7]  }
  0x84   : > { %s748_s5 = sshll.u32 %s842_s10, 4  ;;  %s749_s5 = int_to_ptr.vmem [resolvable:$false] %s748_s5 }
  0x85   : > { %p746_p10 = pnand %p745_p7, %p1167_p0  ;;  %s750_s15 = scalar_lea.vmem %s749_s5, 128 }
  0x86   : > { %p751_p9 = scmp.lt.s32.totalorder %s1104_s11, %s749_s5  ;;  %p752_p1 = scmp.lt.s32.totalorder %s750_s15, %s744_s8 }
  0x87   : > { %p747_p12 = pneg %p746_p10 }
  0x88   : > { %p753_p6 = por %p752_p1, %p751_p9 }
  0x8a   : > { %p754_p2 = pnand %p753_p6, %p747_p12 }
  0x8c   : > { %v655_v57 = vpop.eup %654 }
  0x8d   : > { %v285_v58 = vmul.f32 %v655_v57, %v647_v48  ;;  %v286_v59 = vmul.f32 %v655_v57, %v649_v50  ;;  %v287_v60 = vmul.f32 %v655_v57, %v651_v52  ;;  %v288_v61 = vmul.f32 %v655_v57, %v653_v54 }
  0x8f   : > { %v293_v62 = vsel %vm289_vm0, %v285_v58, 0.0  ;;  %v294_v63 = vsel %vm290_vm1, %v286_v59, 0.0  ;;  %v295_v0 = vsel %vm291_vm2, %v287_v60, 0.0  ;;  %v296_v1 = vsel %vm292_vm3, %v288_v61, 0.0 }
  0x90   : > { %v297_v2 = vrot.slane %v293_v62, 4  ;;  %v303_v3 = vrot.slane %v294_v63, 4  ;;  %v309_v4 = vrot.slane %v295_v0, 4  ;;  %v315_v6 = vrot.slane %v296_v1, 4 }
  0x92   : > { %v298_v7 = vadd.f32 %v297_v2, %v293_v62  ;;  %v304_v8 = vadd.f32 %v303_v3, %v294_v63  ;;  %v310_v9 = vadd.f32 %v309_v4, %v295_v0  ;;  %v316_v10 = vadd.f32 %v315_v6, %v296_v1 }
  0x94   : > { %v299_v11 = vrot.slane %v298_v7, 2  ;;  %v305_v12 = vrot.slane %v304_v8, 2  ;;  %v311_v13 = vrot.slane %v310_v9, 2  ;;  %v317_v14 = vrot.slane %v316_v10, 2 }
  0x96   : > { %v300_v15 = vadd.f32 %v299_v11, %v298_v7  ;;  %v306_v16 = vadd.f32 %v305_v12, %v304_v8  ;;  %v312_v17 = vadd.f32 %v311_v13, %v310_v9  ;;  %v318_v5 = vadd.f32 %v317_v14, %v316_v10 }
  0x98   : > { %v301_v18 = vrot.slane %v300_v15, 1  ;;  %v307_v19 = vrot.slane %v306_v16, 1  ;;  %v313_v20 = vrot.slane %v312_v17, 1  ;;  %v319_v21 = vrot.slane %v318_v5, 1 }
  0x9a   : > { %v302_v22 = vadd.f32 %v301_v18, %v300_v15  ;;  %v308_v23 = vadd.f32 %v307_v19, %v306_v16  ;;  %v314_v24 = vadd.f32 %v313_v20, %v312_v17  ;;  %v320_v25 = vadd.f32 %v319_v21, %v318_v5 }
  0x9c   : > { %v359_v27 = vsel %vm358_vm4, %v308_v23, %v302_v22 }
  0x9d   : > { %v361_v28 = vsel %vm360_vm5, %v314_v24, %v359_v27 }
  0x9e   : > { %v363_v29 = vsel %vm362_vm6, %v320_v25, %v361_v28 }
  0x9f   : > { %v365_v30 = vadd.f32 %v363_v29, %v353_v26 }
  0xa1   : > { %366 = vst [vmem:[%s1026_s6] sm:$0xf] %v365_v30 }
  0xa2   : > { %757 = shalt.err (!%p754_p2)
}
  0xa3   : > { %s758_s30 = scalar_lea.hbm %s1102_s22, 64  ;;  %s762_s9 = scalar_lea.hbm %s1154_s2, 128 }
  0xa4   : > { %p759_p5 = scmp.ne.s32.totalorder %s1102_s22, %s758_s30  ;;  %p763_p8 = scmp.lt.u32.totalorder %s1102_s22, %s1154_s2 }
  0xa5   : > { %p764_p11 = scmp.lt.u32.totalorder %s762_s9, %s758_s30  ;;  %p766_p7 = scmp.lt.u32.totalorder %s758_s30, %s1102_s22 }
  0xa6   : > { %p760_p13 = pnand %p759_p5, %p1167_p0 }
  0xa7   : > { %p765_p4 = por %p764_p11, %p763_p8 }
  0xa8   : > { %p761_p3 = pneg %p760_p13 }
  0xa9   : > { %p767_p10 = por %p766_p7, %p765_p4 }
  0xab   : > { %p768_p12 = pnand %p767_p10, %p761_p3 }
  0xad   : > { %771 = shalt.err (!%p768_p12)
}
  0xae   : > { %575 = dma.vmem_to_hbm [thread:$0]  (%p1167_p0), %s1104_s11, 64, %s1102_s22, %s379_s23  }
  0xaf PF: > { %s422_s4 = sand.u32 1, %s814_s12   ;;  %p1168_p9 = scmp.ne.s32.totalorder %s1161_s27, 0 }
  0xb0   : > { %p1169_p1 = scmp.ge.s32.totalorder %s834_s17, 2  ;;  %s423_s7 = scalar_lea.sflag [#allocation4], %s422_s4 }
  0xb2   : > { %p587_p6 = pnand %p1169_p1, %p1168_p9 }
  0xb4   : > { %805 = dma.done.wait (!%p587_p6), %s423_s7, 64  }
  0xb5   : > { %807 = vsyncadd (!%p587_p6), %s423_s7, 4294967232  ;;  %s432_s19 = scalar_lea.sflag [#allocation9], %s422_s4 }
  0xb6   : > { %809 = dma.done.wait (!%p587_p6), %s432_s19, 64  }
  0xb7   : > { %811 = vsyncadd (!%p587_p6), %s432_s19, 4294967232  ;;  %s26_s17 = sadd.s32 1, %s834_s17   ;;  %s1170_s12 = smov %s818_s13 }
  0xb8   : > { %p23_p2 = scmp.ge.s32.totalorder %s26_s17, 4   ;;  %s1171_s13 = smov %s822_s14 }
  0xb9   : > { %s1172_s14 = smov %s919_s26  ;;  %s1173_s15 = smov %s830_s16 }
  0xba   : > { %s1174_s16 = smov %s1176_s20  ;;  %25 = sbr.rel (!%p23_p2) target bundleno = 10 (0xa), region = 107 }
  0xc1   :  { %437 = vsyncpa [#allocation3], 1 }
  0xc2   :  { %439 = vsyncpa [#allocation3 + $0x1], 1 }
  0xc3   :  { %440 = vsyncpa [#allocation6], 1 }
  0xc4   :  { %442 = vsyncpa [#allocation6 + $0x1], 1 }
  0xc5   :  { %443 = vsyncpa [#allocation4], 1 }
  0xc6   :  { %445 = vsyncpa [#allocation4 + $0x1], 1 }
  0xc7   :  { %446 = vsyncpa [#allocation9], 1 }
  0xc8   :  { %448 = vsyncpa [#allocation9 + $0x1], 1 }

</bundles_post_ra>
